<compile_context>
chip_gen: v5e
topology: v5e:2x2
jax: 0.10.0
libtpu: 0.0.40
codegen_flags: <defaults>
</compile_context>

<pallas_src>
import jax
import jax.numpy as jnp
from jax import lax
from jax.experimental import pallas as pl
from jax.experimental.pallas import tpu as pltpu


def _round_up(x, m):
    return (x + m - 1) // m * m


# ---------- Kernel 1: fused Linear (+ folded BN) + ReLU over collapsed B*N rows ----------
def _fc_relu_kernel(x_ref, w_ref, b_ref, o_ref):
    x = x_ref[...].astype(jnp.bfloat16)                       # bf16 MXU operands
    w = w_ref[...].astype(jnp.bfloat16)
    h = jnp.dot(x, w, preferred_element_type=jnp.float32)     # f32 accumulate
    h = h + b_ref[...]
    o_ref[...] = jnp.maximum(h, 0.0).astype(o_ref.dtype)


def fc_relu_rows(x2d, w, b, *, out_dtype=jnp.bfloat16, tm_target=256):
    """relu(x2d @ w + b) with rows tiled; weight/bias blocks stay VMEM-resident."""
    M, Din = x2d.shape
    Dp = w.shape[1]
    tm = min(tm_target, _round_up(max(M, 16), 16))            # mult of 16 (bf16-safe sublanes)
    Mp = _round_up(M, tm)
    if Mp != M:
        x2d = jnp.pad(x2d, ((0, Mp - M), (0, 0)))
    out = pl.pallas_call(
        _fc_relu_kernel,
        out_shape=jax.ShapeDtypeStruct((Mp, Dp), out_dtype),
        grid=(Mp // tm,),
        in_specs=[
            pl.BlockSpec((tm, Din), lambda i: (i, 0)),
            pl.BlockSpec((Din, Dp), lambda i: (0, 0)),         # resident across row tiles
            pl.BlockSpec((1, Dp), lambda i: (0, 0)),           # resident
        ],
        out_specs=pl.BlockSpec((tm, Dp), lambda i: (i, 0)),
        compiler_params=pltpu.CompilerParams(
            dimension_semantics=("parallel",),
            vmem_limit_bytes=48 * 1024 * 1024,
        ),
    )(x2d, w, b)
    return out[:M] if Mp != M else out


# ---- Kernel 2: 3-NN inverse-distance interpolation + fused skip-FC + residual add ----
def _interp_fc_add_kernel(q_ref, st_ref, f1_ref, p2_ref, w2_ref, b2_ref, o_ref):
    # q_ref : [1, TQ, 3]    query positions tile (xyz2)
    # st_ref: [1, 3, N1]    source positions, pre-transposed (xyz1^T)  [layout plumbing only]
    # f1_ref: [1, N1, Dp]   source features (feats1), bf16
    # p2_ref: [1, TQ, Din2] raw skip features (points2) tile
    # w2_ref: [Din2, Dp], b2_ref: [1, Dp]  folded-BN skip linear
    q = q_ref[0]
    st = st_ref[0]
    n1 = st.shape[1]

    # pairwise squared distances via the MXU: d = |q|^2 + |s|^2 - 2 q.s
    q_sq = jnp.sum(q * q, axis=-1, keepdims=True)                       # [TQ, 1]
    s_sq = jnp.sum(st * st, axis=0, keepdims=True)                      # [1, N1]
    qs2 = jnp.dot(q * jnp.float32(-2.0), st,
                  preferred_element_type=jnp.float32)                   # [TQ, N1]
    d = qs2 + q_sq + s_sq

    # 3 nearest neighbours built as a sparse [TQ, N1] weight matrix -> the gather +
    # weighted sum becomes a single MXU matmul (no dynamic gather needed).
    iota = lax.broadcasted_iota(jnp.int32, d.shape, 1)
    big = jnp.float32(1e30)
    w_mat = jnp.zeros(d.shape, jnp.float32)
    d_cur = d
    for _k in range(3):
        m = jnp.min(d_cur, axis=-1, keepdims=True)                      # [TQ, 1]
        is_min = d_cur == m
        idx = jnp.min(jnp.where(is_min, iota, jnp.int32(n1)), axis=-1, keepdims=True)
        sel = iota == idx                                               # first-occurrence one-hot
        recip = pl.reciprocal(m + 1e-8, approx=True)                    # EUP, not VPU divide
        w_mat = w_mat + jnp.where(sel, recip, 0.0)
        d_cur = jnp.where(sel, big, d_cur)

    norm = jnp.sum(w_mat, axis=-1, keepdims=True)
    w_norm = w_mat * pl.reciprocal(norm, approx=True)

    # interpolation as bf16 MXU matmul with f32 accumulation
    interp = jnp.dot(w_norm.astype(jnp.bfloat16), f1_ref[0],
                     preferred_element_type=jnp.float32)                # [TQ, Dp]

    # fused skip path: feats2 = ReLU(points2 @ w2' + b2')  (BN already folded)
    h2 = jnp.dot(p2_ref[0].astype(jnp.bfloat16),
                 w2_ref[...].astype(jnp.bfloat16),
                 preferred_element_type=jnp.float32)
    feats2 = jnp.maximum(h2 + b2_ref[...], 0.0)

    o_ref[0] = (interp + feats2).astype(o_ref.dtype)


def _pick_tq(n2, n1):
    # ~6 live [TQ, N1] f32 arrays during the 3-NN selection; budget them to ~12 MiB so the
    # block (plus double-buffered feats1 / out tiles) fits comfortably even on v7x (64 MiB).
    budget = 12 * 1024 * 1024
    per_row = 6 * max(n1, 1) * 4
    tq = budget // per_row
    tq = max(8, min(512, (tq // 8) * 8))
    return min(tq, _round_up(n2, 8))


def interp_fc_add(xyz_q, xyz_src_t, feats_src, points_skip, w2, b2, *, tq):
    B, N2p, _ = xyz_q.shape
    N1 = xyz_src_t.shape[2]
    Dp = feats_src.shape[2]
    Din2 = points_skip.shape[2]
    return pl.pallas_call(
        _interp_fc_add_kernel,
        out_shape=jax.ShapeDtypeStruct((B, N2p, Dp), jnp.float32),
        grid=(B, N2p // tq),
        in_specs=[
            pl.BlockSpec((1, tq, 3), lambda b, i: (b, i, 0)),
            pl.BlockSpec((1, 3, N1), lambda b, i: (b, 0, 0)),    # resident across query tiles
            pl.BlockSpec((1, N1, Dp), lambda b, i: (b, 0, 0)),   # resident across query tiles
            pl.BlockSpec((1, tq, Din2), lambda b, i: (b, i, 0)),
            pl.BlockSpec((Din2, Dp), lambda b, i: (0, 0)),       # resident
            pl.BlockSpec((1, Dp), lambda b, i: (0, 0)),          # resident
        ],
        out_specs=pl.BlockSpec((1, tq, Dp), lambda b, i: (b, i, 0)),
        compiler_params=pltpu.CompilerParams(
            dimension_semantics=("parallel", "parallel"),
            vmem_limit_bytes=48 * 1024 * 1024,
        ),
    )(xyz_q, xyz_src_t, feats_src, points_skip, w2, b2)


# ---------------------------- parameters & wrappers ----------------------------
def init_params(key, dim1, dim2, dim_out):
    ks = jax.random.split(key, 8)
    eps = 1e-5

    def linear(kw, kb, din):
        bound = 1.0 / float(din) ** 0.5
        w = jax.random.uniform(kw, (din, dim_out), jnp.float32, -bound, bound)
        b = jax.random.uniform(kb, (1, dim_out), jnp.float32, -bound, bound)
        return w, b

    def bn(kg, kb):
        gamma = jax.random.uniform(kg, (1, dim_out), jnp.float32, 0.5, 1.5)
        beta = jax.random.uniform(kb, (1, dim_out), jnp.float32, -0.5, 0.5)
        running_mean = jnp.zeros((1, dim_out), jnp.float32)
        running_var = jnp.ones((1, dim_out), jnp.float32)
        scale = gamma / jnp.sqrt(running_var + eps)
        shift = beta - running_mean * scale
        return scale, shift

    w1, b1 = linear(ks[0], ks[1], dim1)
    w2, b2 = linear(ks[2], ks[3], dim2)
    s1, sh1 = bn(ks[4], ks[5])
    s2, sh2 = bn(ks[6], ks[7])
    return (w1, b1, s1, sh1, w2, b2, s2, sh2)


def _fold_bn_pad(w, b, scale, shift, d_pad):
    """Fold eval-mode BN into the linear (w' = w*scale, b' = b*scale+shift) and pad the
    output channels to a multiple of 128 so kernel stores are lane-dense."""
    wf = w * scale
    bf = b * scale + shift
    dout = wf.shape[1]
    if d_pad > dout:
        wf = jnp.pad(wf, ((0, 0), (0, d_pad - dout)))
        bf = jnp.pad(bf, ((0, 0), (0, d_pad - dout)))
    return wf, bf


def transition_up(params, xyz1, points1, xyz2, points2):
    w1, b1, s1, sh1, w2, b2, s2, sh2 = params
    B, N1, Din1 = points1.shape
    _, N2, Din2 = points2.shape
    dim_out = w1.shape[1]
    d_pad = _round_up(dim_out, 128)

    w1f, b1f = _fold_bn_pad(w1, b1, s1, sh1, d_pad)
    w2f, b2f = _fold_bn_pad(w2, b2, s2, sh2, d_pad)

    # feats1 over collapsed B*N1 rows, stored bf16 (half HBM traffic into the interp kernel)
    feats1 = fc_relu_rows(points1.reshape(B * N1, Din1), w1f, b1f,
                          out_dtype=jnp.bfloat16).reshape(B, N1, d_pad)

    if N1 == 1:
        # PointNetFeaturePropagation S == 1 branch: plain repeat, no interpolation.
        feats2 = fc_relu_rows(points2.reshape(B * N2, Din2), w2f, b2f,
                              out_dtype=jnp.float32).reshape(B, N2, d_pad)
        out = feats1.astype(jnp.float32) + feats2
        return out[:, :, :dim_out]

    # TODO(synk): if N1 < 3 the kernel keeps masked 1e30 "neighbors" with ~1e-30 weight
    # instead of erroring like top_k(k=3); only affects degenerate inputs.

    tq = _pick_tq(N2, N1)
    N2p = _round_up(N2, tq)
    xyz2p = xyz2 if N2p == N2 else jnp.pad(xyz2, ((0, 0), (0, N2p - N2), (0, 0)))
    points2p = points2 if N2p == N2 else jnp.pad(points2, ((0, 0), (0, N2p - N2), (0, 0)))

    xyz1_t = jnp.transpose(xyz1, (0, 2, 1))            # [B, 3, N1] layout plumbing (tiny)
    out = interp_fc_add(xyz2p, xyz1_t, feats1, points2p, w2f, b2f, tq=tq)
    return out[:, :N2, :dim_out]


# ------------------------------ pure-JAX reference ------------------------------
def transition_up_ref(params, xyz1, points1, xyz2, points2):
    w1, b1, s1, sh1, w2, b2, s2, sh2 = params

    def fc(x, w, b, s, sh):
        return jnp.maximum((x @ w + b) * s + sh, 0.0)

    feats1 = fc(points1, w1, b1, s1, sh1)
    feats2 = fc(points2, w2, b2, s2, sh2)
    d = jnp.sum((xyz2[:, :, None, :] - xyz1[:, None, :, :]) ** 2, axis=-1)  # [B, N2, N1]
    neg_d3, idx = lax.top_k(-d, 3)
    d3 = -neg_d3
    recip = 1.0 / (d3 + 1e-8)
    weight = recip / jnp.sum(recip, axis=-1, keepdims=True)                 # [B, N2, 3]
    gathered = jax.vmap(lambda f, i: f[i])(feats1, idx)                     # [B, N2, 3, D]
    interp = jnp.sum(gathered * weight[..., None], axis=2)
    return interp + feats2


if __name__ == "__main__":
    B, N1, N2 = 2, 16, 32          # N1: coarse set, N2: fine set
    dim1, dim2, dim_out = 32, 16, 64

    key = jax.random.PRNGKey(0)
    k_xyz1, k_p1, k_xyz2, k_p2, k_params = jax.random.split(key, 5)
    xyz1 = jax.random.normal(k_xyz1, (B, N1, 3), jnp.float32)
    points1 = jax.random.normal(k_p1, (B, N1, dim1), jnp.float32)
    xyz2 = jax.random.normal(k_xyz2, (B, N2, 3), jnp.float32)
    points2 = jax.random.normal(k_p2, (B, N2, dim2), jnp.float32)
    params = init_params(k_params, dim1, dim2, dim_out)

    out = transition_up(params, xyz1, points1, xyz2, points2)
    out = jax.block_until_ready(out)
    assert out.shape == (B, N2, dim_out)

    ref = transition_up_ref(params, xyz1, points1, xyz2, points2)
    # bf16 MXU operands + approx (EUP) reciprocals -> loosened tolerance vs f32 reference.
    max_err = float(jnp.max(jnp.abs(out - ref)))
    assert jnp.allclose(out, ref, atol=5e-2, rtol=5e-2), max_err
    print("KERNEL_OK")
</pallas_src>

<mosaic_0001>
module attributes {stable_mosaic.version = 11 : i64} {
  func.func @_fc_relu_kernel(%arg0: i32, %arg1: memref<32x32xf32, #tpu.memory_space<vmem>>, %arg2: memref<32x128xf32, #tpu.memory_space<vmem>>, %arg3: memref<1x128xf32, #tpu.memory_space<vmem>>, %arg4: memref<32x128xbf16, #tpu.memory_space<vmem>>) attributes {dimension_semantics = [#tpu.dimension_semantics<parallel>], iteration_bounds = array<i64: 1>, scalar_prefetch = 0 : i64, scratch_operands = 0 : i64, tpu.core_type = #tpu.core_type<tc>, window_params = [{transform_indices = @transform_0, window_bounds = array<i64: 32, 32>}, {pipeline_mode = #tpu.pipeline_mode<synchronous>, transform_indices = @transform_1, window_bounds = array<i64: 32, 128>}, {pipeline_mode = #tpu.pipeline_mode<synchronous>, transform_indices = @transform_2, window_bounds = array<i64: 1, 128>}, {transform_indices = @transform_3, window_bounds = array<i64: 32, 128>}]} {
    %c0 = arith.constant 0 : index
    %c0_0 = arith.constant 0 : index
    %0 = vector.load %arg1[%c0, %c0_0] : memref<32x32xf32, #tpu.memory_space<vmem>>, vector<32x32xf32>
    %1 = arith.truncf %0 : vector<32x32xf32> to vector<32x32xbf16>
    %c0_1 = arith.constant 0 : index
    %c0_2 = arith.constant 0 : index
    %2 = vector.load %arg2[%c0_1, %c0_2] : memref<32x128xf32, #tpu.memory_space<vmem>>, vector<32x128xf32>
    %3 = arith.truncf %2 : vector<32x128xf32> to vector<32x128xbf16>
    %cst = arith.constant dense<0.000000e+00> : vector<32x128xf32>
    %4 = tpu.matmul %1, %3, %cst {dimension_numbers = #tpu.dot_dimension_numbers<[1], [0], [0], [1], [0, 0, 1, 1], [], []>} : vector<32x32xbf16>, vector<32x128xbf16>, vector<32x128xf32> -> vector<32x128xf32>
    %c0_3 = arith.constant 0 : index
    %c0_4 = arith.constant 0 : index
    %5 = vector.load %arg3[%c0_3, %c0_4] : memref<1x128xf32, #tpu.memory_space<vmem>>, vector<1x128xf32>
    %6 = vector.broadcast %5 : vector<1x128xf32> to vector<32x128xf32>
    %7 = arith.addf %4, %6 : vector<32x128xf32>
    %cst_5 = arith.constant 0.000000e+00 : f32
    %8 = vector.broadcast %cst_5 : f32 to vector<32x128xf32>
    %9 = arith.maximumf %7, %8 : vector<32x128xf32>
    %10 = arith.truncf %9 : vector<32x128xf32> to vector<32x128xbf16>
    %c0_6 = arith.constant 0 : index
    %c0_7 = arith.constant 0 : index
    %11 = vector.load %arg4[%c0_6, %c0_7] : memref<32x128xbf16, #tpu.memory_space<vmem>>, vector<32x128xbf16>
    tpu.vector_store %arg4[%c0_6, %c0_7], %10 {strides = array<i32>} : memref<32x128xbf16, #tpu.memory_space<vmem>>, vector<32x128xbf16>,
    return
  }
  func.func @transform_0(%arg0: i32) -> (i32, i32) {
    %c0_i32 = arith.constant 0 : i32
    %c0_i32_0 = arith.constant 0 : i32
    return %arg0, %c0_i32 : i32, i32
  }
  func.func @transform_1(%arg0: i32) -> (i32, i32) {
    %c0_i32 = arith.constant 0 : i32
    %c0_i32_0 = arith.constant 0 : i32
    %c0_i32_1 = arith.constant 0 : i32
    return %c0_i32, %c0_i32_0 : i32, i32
  }
  func.func @transform_2(%arg0: i32) -> (i32, i32) {
    %c0_i32 = arith.constant 0 : i32
    %c0_i32_0 = arith.constant 0 : i32
    %c0_i32_1 = arith.constant 0 : i32
    return %c0_i32, %c0_i32_0 : i32, i32
  }
  func.func @transform_3(%arg0: i32) -> (i32, i32) {
    %c0_i32 = arith.constant 0 : i32
    %c0_i32_0 = arith.constant 0 : i32
    return %arg0, %c0_i32 : i32, i32
  }
}

</mosaic_0001>

<bundles_post_ra>
// kernel: tpu_custom_call.1
= control target key start
LH: loop header
LB: loop body
LE: loop exit
PB: predicated region body
PF: predicated region fallthrough
CT: control target
= control target key end

     0   :  { %8 = vsyncpa [#allocation3], 0  ;;  %s262_s0 = inlined_call_operand.hbm [shape: f32[32,32], index: 0, kind: input, shape index: {}]   ;;  %s263_s1 = inlined_call_operand.hbm [shape: f32[32,128], index: 1, kind: input, shape index: {}]   ;;  %s264_s2 = inlined_call_operand.vmem [shape: f32[1,128], index: 2, kind: input, shape index: {}]   ;;  %s265_s3 = inlined_call_operand.hbm [shape: bf16[32,128], index: 3, kind: output, shape index: {}]  }
   0x1   :  { %9 = vsyncpa [#allocation6], 0 }
   0x2   :  { %10 = vsyncpa [#allocation4], 0  ;;  %s15_s14 = sshll.u32 %s262_s0, 4  ;;  %s223_s15 = smov [#allocation2]   ;;  %s16_s14 = int_to_ptr.hbm [resolvable:$true] %s15_s14 }
   0x3   :  { %s17_s16 = sshll.u32 %s223_s15, 4  ;;  %s28_s19 = sshll.u32 %s263_s1, 4  ;;  %s18_s16 = int_to_ptr.vmem [resolvable:$true] %s17_s16  ;;  %s29_s19 = int_to_ptr.hbm [resolvable:$true] %s28_s19 }
   0x4   :  { %s224_s20 = smov 128   ;;  %s225_s21 = smov 8  }
   0x5   :  { %23 = dma.hbm_to_vmem [thread:$0]  %s16_s14, 512, %s18_s16, [#allocation3], %s224_s20, %s224_s20, %s225_s21  }
   0x6   :  { %s226_s22 = smov [#allocation5]  }
   0x7   :  { %s30_s23 = sshll.u32 %s226_s22, 4  ;;  %s31_s23 = int_to_ptr.vmem [resolvable:$true] %s30_s23 }
   0x8   :  { %36 = dma.hbm_to_vmem [thread:$0]  %s29_s19, 512, %s31_s23, [#allocation6], %s224_s20, %s224_s20, %s225_s21  }
   0x9   :  { %217 = dma.done.wait [#allocation3], 512  }
   0xa   :  { %218 = vsyncadd [#allocation3], 4294966784 }
   0xb   :  { %219 = dma.done.wait [#allocation6], 512  }
   0xc   :  { %220 = vsyncadd [#allocation6], 4294966784  ;;  %v56_v0 = vld [vmem:[#allocation5 + $0x10] sm:$0xff]  ;;  %v57_v1 = vld [vmem:[#allocation5 + $0x18] sm:$0xff]  ;;  %vm64_vm0 = vcmask 261120   ;;  %s227_s24 = smov [#allocation7]  }
   0xd   :  { %v54_v2 = vld [vmem:[#allocation5] sm:$0xff]  ;;  %v59_v3 = vpack.c.bf16 %v57_v1, %v56_v0  ;;  %v55_v4 = vld [vmem:[#allocation5 + $0x8] sm:$0xff]  ;;  %v50_v8 = vld [vmem:[#allocation2 + $0x10] sm:$0xff]  ;;  %s106_s25 = sshll.u32 %s227_s24, 4  ;;  %s108_s28 = sshll.u32 %s265_s3, 4  ;;  %s107_s25 = int_to_ptr.vmem [resolvable:$true] %s106_s25  ;;  %s109_s28 = int_to_ptr.hbm [resolvable:$true] %s108_s28 }
   0xe   :  { %v48_v5 = vld [vmem:[#allocation2] sm:$0xff]  ;;  %v58_v6 = vpack.c.bf16 %v55_v4, %v54_v2  ;;  %v49_v7 = vld [vmem:[#allocation2 + $0x8] sm:$0xff]  ;;  %v51_v9 = vld [vmem:[#allocation2 + $0x18] sm:$0xff]  ;;  %s229_s29 = smov 4  }
   0xf   :  { %77 = vmatpush.bf16.msra.mxu0 %v59_v3  ;;  %135 = vmatpush.bf16.msra.mxu1 %v59_v3  ;;  %v52_v10 = vpack.c.bf16 %v49_v7, %v48_v5  ;;  %v53_v11 = vpack.c.bf16 %v51_v9, %v50_v8  ;;  %v144_v14 = vld [vmem:[%s264_s2] ss:$0 sm:$0xff]  ;;  %s228_s2 = smov 64  }
  0x13   :  { %78 = vmatpush.bf16.msra.mxu0 %v58_v6  ;;  %136 = vmatpush.bf16.msra.mxu1 %v58_v6 }
  0x16   :  { %122 = vmatmul.msk.bf16.vlgmr.msra.gmra.mxu0 %vm64_vm0, %v52_v10  ;;  %123 = vmatmul.msk.bf16.vlgmr.msra.gmra.mxu1 %vm64_vm0, %v53_v11 }
  0x93   :  { %v80_v12 = vpop.f32.mrf.mxu0  ;;  %v85_v13 = vpop.f32.mrf.mxu1 }
  0x94   :  { %v81_v15 = vadd.f32 %v144_v14, %v80_v12  ;;  %v86_v16 = vadd.f32 %v144_v14, %v85_v13 }
  0x96   :  { %v90_v21 = vmax.f32 %v81_v15, 0.0  ;;  %v92_v22 = vmax.f32 %v86_v16, 0.0 }
  0x9b   :  { %v82_v17 = vpop.f32.mrf.mxu0  ;;  %v87_v18 = vpop.f32.mrf.mxu1 }
  0x9c   :  { %v83_v19 = vadd.f32 %v144_v14, %v82_v17  ;;  %v88_v20 = vadd.f32 %v144_v14, %v87_v18 }
  0x9e   :  { %v91_v23 = vmax.f32 %v83_v19, 0.0  ;;  %v93_v24 = vmax.f32 %v88_v20, 0.0 }
  0xa0   :  { %v127_v25 = vpack.c.bf16 %v91_v23, %v90_v21  ;;  %v132_v26 = vpack.c.bf16 %v93_v24, %v92_v22 }
  0xa2   :  { %128 = vst [vmem:[#allocation7] sm:$0xff] %v127_v25  }
  0xa3   :  { %134 = vst [vmem:[#allocation7 + $0x8] sm:$0xff] %v132_v26  }
  0xa4   :  { %114 = dma.vmem_to_hbm [thread:$0]  %s107_s25, 256, %s109_s28, [#allocation4], %s228_s2, %s228_s2, %s229_s29  }
  0xa5   :  { %221 = dma.done.wait [#allocation4], 256  }
  0xa6   :  { %222 = vsyncadd [#allocation4], 4294967040 }
  0xa7   :  { %119 = vsyncpa [#allocation3], 1 }
  0xa8   :  { %120 = vsyncpa [#allocation6], 1 }
  0xa9   :  { %121 = vsyncpa [#allocation4], 1 }

</bundles_post_ra>
